<compile_context>
chip_gen: v6e
topology: v6e:2x2x1
jax: 0.10.0
libtpu: 0.0.40
codegen_flags: <defaults>
</compile_context>

<pallas_src>
import jax
import jax.numpy as jnp
from jax.experimental import pallas as pl
from jax.experimental.pallas import tpu as pltpu


def _round_up(x, m):
    return (x + m - 1) // m * m


def _advers_mask_kernel(seg_ref, x_ref, w1_ref, b1_ref, w2_ref, b2_ref,
                        wfc_ref, bfc_ref, gum_ref, a_ref, out_ref, acc_ref):
    i = pl.program_id(0)

    @pl.when(i == 0)
    def _():
        acc_ref[...] = jnp.zeros_like(acc_ref)

    # --- MLP encoder on this node tile: Linear -> PReLU -> Dropout(eval) -> Linear
    x = x_ref[...]                                                 # [T, D_in]
    h = jnp.dot(x, w1_ref[...], preferred_element_type=jnp.float32) + b1_ref[...]
    a = a_ref[0]                                                   # PReLU slope (SMEM scalar)
    h = jnp.where(h >= 0.0, h, a * h)
    emb = jnp.dot(h, w2_ref[...], preferred_element_type=jnp.float32) + b2_ref[...]
    # emb: [T, H]

    # --- global_add_pool: on-the-fly [T, S] one-hot (padded rows carry id -1
    #     -> all-zero row), accumulated into the persistent [S, H] scratch.
    seg = seg_ref[...]                                             # [T, 1] int32
    t = seg.shape[0]
    s_pad = acc_ref.shape[0]
    s_iota = jax.lax.broadcasted_iota(jnp.int32, (t, s_pad), 1)
    onehot = (s_iota == seg).astype(jnp.float32)                   # [T, S]
    acc_ref[...] += jax.lax.dot_general(                           # onehot^T @ emb
        onehot, emb, (((0,), (0,)), ((), ())),
        preferred_element_type=jnp.float32)

    # --- finalize on the last node tile: fc_mlp + hard gumbel-softmax (tau=1)
    @pl.when(i == pl.num_programs(0) - 1)
    def _():
        sub_emb = acc_ref[...]                                     # [S, H]
        logits = jnp.dot(sub_emb, wfc_ref[...],
                         preferred_element_type=jnp.float32) + bfc_ref[...]
        y = logits + gum_ref[...]                                  # [S, C_pad]
        col = jax.lax.broadcasted_iota(jnp.int32, y.shape, 1)
        y0 = jnp.max(jnp.where(col == 0, y, -jnp.inf), axis=-1, keepdims=True)
        y1 = jnp.max(jnp.where(col == 1, y, -jnp.inf), axis=-1, keepdims=True)
        win0 = (y0 >= y1).astype(jnp.float32)                      # ties -> class 0
        out_ref[...] = jnp.where(col == 0, win0,
                                 jnp.where(col == 1, 1.0 - win0, 0.0))


def sub_advers_mask_forward(x, subgraph_id, params, gumbel_key, *,
                            max_subgraphs=128, tile_n=256):
    """Relabel subgraph ids, pad to TPU-friendly shapes, run the fused Pallas
    kernel (node-tiled MLP + segment-sum + fc + hard gumbel-softmax), then
    gather the per-node mask probabilities in plain JAX."""
    n, d_in = x.shape
    hdim = params["w1"].shape[1]
    num_class = params["wfc"].shape[1]

    # torch.unique(subgraph_id, return_inverse=True) equivalent.
    # max_subgraphs must upper-bound the true number of distinct subgraph ids.
    _, new_ids = jnp.unique(subgraph_id, return_inverse=True, size=max_subgraphs)
    new_ids = new_ids.astype(jnp.int32)

    s_pad = _round_up(max_subgraphs, 128)       # subgraph slots (lane-friendly)
    c_pad = 128                                 # lane-dense class/output width
    assert tile_n % 8 == 0
    n_pad = _round_up(max(n, tile_n), tile_n)

    # node padding: zero features, segment id -1 -> zero one-hot contribution
    x_p = jnp.zeros((n_pad, d_in), x.dtype).at[:n].set(x)
    seg_p = jnp.full((n_pad, 1), -1, jnp.int32).at[:n, 0].set(new_ids)

    # fc weight/bias and gumbel noise padded to the lane-dense class width
    wfc_p = jnp.zeros((hdim, c_pad), jnp.float32).at[:, :num_class].set(params["wfc"])
    bfc_p = jnp.zeros((1, c_pad), jnp.float32).at[:, :num_class].set(params["bfc"])
    u = jax.random.uniform(gumbel_key, (s_pad, num_class), jnp.float32,
                           minval=1e-10, maxval=1.0)
    gum_p = jnp.zeros((s_pad, c_pad), jnp.float32).at[:, :num_class].set(
        -jnp.log(-jnp.log(u)))

    full2d = lambda shape: pl.BlockSpec(shape, lambda i: (0, 0))
    sub_onehot_pad = pl.pallas_call(
        _advers_mask_kernel,
        out_shape=jax.ShapeDtypeStruct((s_pad, c_pad), jnp.float32),
        grid=(n_pad // tile_n,),
        in_specs=[
            pl.BlockSpec((tile_n, 1), lambda i: (i, 0)),        # segment ids
            pl.BlockSpec((tile_n, d_in), lambda i: (i, 0)),     # x node tile
            full2d((d_in, hdim)),                               # w1
            full2d((1, hdim)),                                  # b1
            full2d((hdim, hdim)),                               # w2
            full2d((1, hdim)),                                  # b2
            full2d((hdim, c_pad)),                              # wfc (padded)
            full2d((1, c_pad)),                                 # bfc (padded)
            full2d((s_pad, c_pad)),                             # gumbel noise
            pl.BlockSpec(memory_space=pltpu.MemorySpace.SMEM),  # PReLU slope
        ],
        out_specs=full2d((s_pad, c_pad)),
        scratch_shapes=[pltpu.VMEM((s_pad, hdim), jnp.float32)],
        compiler_params=pltpu.CompilerParams(
            dimension_semantics=("arbitrary",),
            vmem_limit_bytes=32 * 1024 * 1024),
    )(seg_p, x_p, params["w1"], params["b1"], params["w2"], params["b2"],
      wfc_p, bfc_p, gum_p, params["prelu_a"])

    # node_prob = subgraph_prob[new_subgraph_id]  (tiny 2-wide gather in JAX)
    return jnp.take(sub_onehot_pad[:, :num_class], new_ids, axis=0)


def init_params(key, in_dim, num_hidden, num_class=2):
    k1, k2, k3 = jax.random.split(key, 3)
    return {
        "w1": (jax.random.normal(k1, (in_dim, num_hidden), jnp.float32)
               * (1.0 / jnp.sqrt(in_dim))),
        "b1": jnp.zeros((1, num_hidden), jnp.float32),
        "prelu_a": jnp.full((1,), 0.25, jnp.float32),   # nn.PReLU default slope
        "w2": (jax.random.normal(k2, (num_hidden, num_hidden), jnp.float32)
               * (1.0 / jnp.sqrt(num_hidden))),
        "b2": jnp.zeros((1, num_hidden), jnp.float32),
        "wfc": (jax.random.normal(k3, (num_hidden, num_class), jnp.float32)
                * (1.0 / jnp.sqrt(num_hidden))),
        "bfc": jnp.zeros((1, num_class), jnp.float32),
    }


if __name__ == "__main__":
    key = jax.random.PRNGKey(0)
    k_x, k_param, k_gumbel = jax.random.split(key, 3)

    N, IN_DIM, NUM_HIDDEN, MAX_SUB = 16, 8, 32, 8
    x = jax.random.normal(k_x, (N, IN_DIM), jnp.float32)
    # arbitrary (non-contiguous) subgraph labels, as graph.ndata['subgraph_id']
    subgraph_id = jnp.array([3, 3, 7, 7, 7, 11, 11, 42,
                             42, 42, 3, 11, 7, 42, 11, 3], jnp.int32)

    params = init_params(k_param, IN_DIM, NUM_HIDDEN)
    # tile_n=8 -> 2-step grid exercises the cross-tile segment-sum accumulator
    z = sub_advers_mask_forward(x, subgraph_id, params, k_gumbel,
                                max_subgraphs=MAX_SUB, tile_n=8)
    z = jax.block_until_ready(z)

    assert z.shape == (N, 2) and z.dtype == jnp.float32
    # each row must be a one-hot over the 2 classes
    assert bool(jnp.all(jnp.sum(z, axis=-1) == 1.0))

    # pure-JAX reference of the same forward (same gumbel draw)
    def ref_forward(x, subgraph_id, params, gumbel_key, max_subgraphs):
        _, ids = jnp.unique(subgraph_id, return_inverse=True, size=max_subgraphs)
        h = x @ params["w1"] + params["b1"]
        h = jnp.where(h >= 0, h, params["prelu_a"][0] * h)
        emb = h @ params["w2"] + params["b2"]
        sub = jax.ops.segment_sum(emb, ids, num_segments=max_subgraphs)
        logits = sub @ params["wfc"] + params["bfc"]
        s_pad = _round_up(max_subgraphs, 128)
        u = jax.random.uniform(gumbel_key, (s_pad, 2), jnp.float32,
                               minval=1e-10, maxval=1.0)
        y = logits + (-jnp.log(-jnp.log(u)))[:max_subgraphs]
        onehot = jax.nn.one_hot(jnp.argmax(y, axis=-1), 2, dtype=jnp.float32)
        return onehot[ids]

    z_ref = ref_forward(x, subgraph_id, params, k_gumbel, MAX_SUB)
    assert bool(jnp.all(z == z_ref))
    print("KERNEL_OK")
</pallas_src>

<mosaic_0001>
module attributes {stable_mosaic.version = 11 : i64} {
  func.func @_advers_mask_kernel(%arg0: i32, %arg1: memref<8x1xi32, #tpu.memory_space<vmem>>, %arg2: memref<8x8xf32, #tpu.memory_space<vmem>>, %arg3: memref<8x32xf32, #tpu.memory_space<vmem>>, %arg4: memref<1x32xf32, #tpu.memory_space<vmem>>, %arg5: memref<32x32xf32, #tpu.memory_space<vmem>>, %arg6: memref<1x32xf32, #tpu.memory_space<vmem>>, %arg7: memref<32x128xf32, #tpu.memory_space<vmem>>, %arg8: memref<1x128xf32, #tpu.memory_space<vmem>>, %arg9: memref<128x128xf32, #tpu.memory_space<vmem>>, %arg10: memref<1xf32, #tpu.memory_space<smem>>, %arg11: memref<128x128xf32, #tpu.memory_space<vmem>>, %arg12: memref<128x32xf32, #tpu.memory_space<vmem>>) attributes {dimension_semantics = [#tpu.dimension_semantics<arbitrary>], iteration_bounds = array<i64: 2>, scalar_prefetch = 0 : i64, scratch_operands = 1 : i64, tpu.core_type = #tpu.core_type<tc>, window_params = [{transform_indices = @transform_0, window_bounds = array<i64: 8, 1>}, {transform_indices = @transform_1, window_bounds = array<i64: 8, 8>}, {pipeline_mode = #tpu.pipeline_mode<synchronous>, transform_indices = @transform_2, window_bounds = array<i64: 8, 32>}, {pipeline_mode = #tpu.pipeline_mode<synchronous>, transform_indices = @transform_3, window_bounds = array<i64: 1, 32>}, {pipeline_mode = #tpu.pipeline_mode<synchronous>, transform_indices = @transform_4, window_bounds = array<i64: 32, 32>}, {pipeline_mode = #tpu.pipeline_mode<synchronous>, transform_indices = @transform_5, window_bounds = array<i64: 1, 32>}, {pipeline_mode = #tpu.pipeline_mode<synchronous>, transform_indices = @transform_6, window_bounds = array<i64: 32, 128>}, {pipeline_mode = #tpu.pipeline_mode<synchronous>, transform_indices = @transform_7, window_bounds = array<i64: 1, 128>}, {pipeline_mode = #tpu.pipeline_mode<synchronous>, transform_indices = @transform_8, window_bounds = array<i64: 128, 128>}, {transform_indices = @transform_9, window_bounds = array<i64: 1>}, {pipeline_mode = #tpu.pipeline_mode<synchronous>, transform_indices = @transform_10, window_bounds = array<i64: 128, 128>}]} {
    %c0_i32 = arith.constant 0 : i32
    %0 = arith.cmpi eq, %arg0, %c0_i32 : i32
    %1 = arith.extui %0 : i1 to i32
    %c0_i32_0 = arith.constant 0 : i32
    %2 = arith.cmpi ne, %1, %c0_i32_0 : i32
    scf.if %2 {
      %cst_21 = arith.constant 0.000000e+00 : f32
      %33 = vector.broadcast %cst_21 : f32 to vector<128x32xf32>
      %c0_22 = arith.constant 0 : index
      %c0_23 = arith.constant 0 : index
      %34 = vector.load %arg12[%c0_22, %c0_23] : memref<128x32xf32, #tpu.memory_space<vmem>>, vector<128x32xf32>
      tpu.vector_store %arg12[%c0_22, %c0_23], %33 {strides = array<i32>} : memref<128x32xf32, #tpu.memory_space<vmem>>, vector<128x32xf32>,
    } else {
    }
    %c0 = arith.constant 0 : index
    %c0_1 = arith.constant 0 : index
    %3 = vector.load %arg2[%c0, %c0_1] : memref<8x8xf32, #tpu.memory_space<vmem>>, vector<8x8xf32>
    %c0_2 = arith.constant 0 : index
    %c0_3 = arith.constant 0 : index
    %4 = vector.load %arg3[%c0_2, %c0_3] : memref<8x32xf32, #tpu.memory_space<vmem>>, vector<8x32xf32>
    %cst = arith.constant dense<0.000000e+00> : vector<8x32xf32>
    %5 = tpu.matmul %3, %4, %cst {dimension_numbers = #tpu.dot_dimension_numbers<[1], [0], [0], [1], [0, 0, 1, 1], [], []>} : vector<8x8xf32>, vector<8x32xf32>, vector<8x32xf32> -> vector<8x32xf32>
    %c0_4 = arith.constant 0 : index
    %c0_5 = arith.constant 0 : index
    %6 = vector.load %arg4[%c0_4, %c0_5] : memref<1x32xf32, #tpu.memory_space<vmem>>, vector<1x32xf32>
    %7 = vector.broadcast %6 : vector<1x32xf32> to vector<8x32xf32>
    %8 = arith.addf %5, %7 : vector<8x32xf32>
    %c0_6 = arith.constant 0 : index
    %9 = memref.load %arg10[%c0_6] : memref<1xf32, #tpu.memory_space<smem>>
    %cst_7 = arith.constant 0.000000e+00 : f32
    %10 = vector.broadcast %cst_7 : f32 to vector<8x32xf32>
    %11 = arith.cmpf oge, %8, %10 : vector<8x32xf32>
    %12 = vector.broadcast %9 : f32 to vector<8x32xf32>
    %13 = arith.mulf %12, %8 : vector<8x32xf32>
    %14 = arith.select %11, %8, %13 : vector<8x32xi1>, vector<8x32xf32>
    %c0_8 = arith.constant 0 : index
    %c0_9 = arith.constant 0 : index
    %15 = vector.load %arg5[%c0_8, %c0_9] : memref<32x32xf32, #tpu.memory_space<vmem>>, vector<32x32xf32>
    %cst_10 = arith.constant dense<0.000000e+00> : vector<8x32xf32>
    %16 = tpu.matmul %14, %15, %cst_10 {dimension_numbers = #tpu.dot_dimension_numbers<[1], [0], [0], [1], [0, 0, 1, 1], [], []>} : vector<8x32xf32>, vector<32x32xf32>, vector<8x32xf32> -> vector<8x32xf32>
    %c0_11 = arith.constant 0 : index
    %c0_12 = arith.constant 0 : index
    %17 = vector.load %arg6[%c0_11, %c0_12] : memref<1x32xf32, #tpu.memory_space<vmem>>, vector<1x32xf32>
    %18 = vector.broadcast %17 : vector<1x32xf32> to vector<8x32xf32>
    %19 = arith.addf %16, %18 : vector<8x32xf32>
    %c0_13 = arith.constant 0 : index
    %c0_14 = arith.constant 0 : index
    %20 = vector.load %arg1[%c0_13, %c0_14] : memref<8x1xi32, #tpu.memory_space<vmem>>, vector<8x1xi32>
    %21 = tpu.iota {dimensions = array<i32: 1>} : vector<8x128xi32>
    %22 = vector.broadcast %20 : vector<8x1xi32> to vector<8x128xi32>
    %23 = arith.cmpi eq, %21, %22 : vector<8x128xi32>
    %24 = arith.extui %23 : vector<8x128xi1> to vector<8x128xi32>
    %25 = arith.sitofp %24 : vector<8x128xi32> to vector<8x128xf32>
    %c0_15 = arith.constant 0 : index
    %c0_16 = arith.constant 0 : index
    %26 = vector.load %arg12[%c0_15, %c0_16] : memref<128x32xf32, #tpu.memory_space<vmem>>, vector<128x32xf32>
    %cst_17 = arith.constant dense<0.000000e+00> : vector<128x32xf32>
    %27 = tpu.matmul %25, %19, %cst_17 {dimension_numbers = #tpu.dot_dimension_numbers<[0], [0], [1], [1], [0, 1, 1, 1], [], []>} : vector<8x128xf32>, vector<8x32xf32>, vector<128x32xf32> -> vector<128x32xf32>
    %28 = arith.addf %26, %27 : vector<128x32xf32>
    %c0_18 = arith.constant 0 : index
    %c0_19 = arith.constant 0 : index
    %29 = vector.load %arg12[%c0_18, %c0_19] : memref<128x32xf32, #tpu.memory_space<vmem>>, vector<128x32xf32>
    tpu.vector_store %arg12[%c0_18, %c0_19], %28 {strides = array<i32>} : memref<128x32xf32, #tpu.memory_space<vmem>>, vector<128x32xf32>,
    %c1_i32 = arith.constant 1 : i32
    %30 = arith.cmpi eq, %arg0, %c1_i32 : i32
    %31 = arith.extui %30 : i1 to i32
    %c0_i32_20 = arith.constant 0 : i32
    %32 = arith.cmpi ne, %31, %c0_i32_20 : i32
    scf.if %32 {
      %c0_21 = arith.constant 0 : index
      %c0_22 = arith.constant 0 : index
      %33 = vector.load %arg12[%c0_21, %c0_22] : memref<128x32xf32, #tpu.memory_space<vmem>>, vector<128x32xf32>
      %c0_23 = arith.constant 0 : index
      %c0_24 = arith.constant 0 : index
      %34 = vector.load %arg7[%c0_23, %c0_24] : memref<32x128xf32, #tpu.memory_space<vmem>>, vector<32x128xf32>
      %cst_25 = arith.constant dense<0.000000e+00> : vector<128x128xf32>
      %35 = tpu.matmul %33, %34, %cst_25 {dimension_numbers = #tpu.dot_dimension_numbers<[1], [0], [0], [1], [0, 0, 1, 1], [], []>} : vector<128x32xf32>, vector<32x128xf32>, vector<128x128xf32> -> vector<128x128xf32>
      %c0_26 = arith.constant 0 : index
      %c0_27 = arith.constant 0 : index
      %36 = vector.load %arg8[%c0_26, %c0_27] : memref<1x128xf32, #tpu.memory_space<vmem>>, vector<1x128xf32>
      %37 = vector.broadcast %36 : vector<1x128xf32> to vector<128x128xf32>
      %38 = arith.addf %35, %37 : vector<128x128xf32>
      %c0_28 = arith.constant 0 : index
      %c0_29 = arith.constant 0 : index
      %39 = vector.load %arg9[%c0_28, %c0_29] : memref<128x128xf32, #tpu.memory_space<vmem>>, vector<128x128xf32>
      %40 = arith.addf %38, %39 : vector<128x128xf32>
      %41 = tpu.iota {dimensions = array<i32: 1>} : vector<128x128xi32>
      %c0_i32_30 = arith.constant 0 : i32
      %42 = vector.broadcast %c0_i32_30 : i32 to vector<128x128xi32>
      %43 = arith.cmpi eq, %41, %42 : vector<128x128xi32>
      %cst_31 = arith.constant 0xFF800000 : f32
      %44 = vector.broadcast %cst_31 : f32 to vector<128x128xf32>
      %45 = arith.select %43, %40, %44 : vector<128x128xi1>, vector<128x128xf32>
      %cst_32 = arith.constant dense<0xFF800000> : vector<128xf32>
      %46 = vector.multi_reduction <maximumf>, %45, %cst_32 [1] : vector<128x128xf32> to vector<128xf32>
      %47 = vector.shape_cast %46 : vector<128xf32> to vector<128x1xf32>
      %c1_i32_33 = arith.constant 1 : i32
      %48 = vector.broadcast %c1_i32_33 : i32 to vector<128x128xi32>
      %49 = arith.cmpi eq, %41, %48 : vector<128x128xi32>
      %cst_34 = arith.constant 0xFF800000 : f32
      %50 = vector.broadcast %cst_34 : f32 to vector<128x128xf32>
      %51 = arith.select %49, %40, %50 : vector<128x128xi1>, vector<128x128xf32>
      %cst_35 = arith.constant dense<0xFF800000> : vector<128xf32>
      %52 = vector.multi_reduction <maximumf>, %51, %cst_35 [1] : vector<128x128xf32> to vector<128xf32>
      %53 = vector.shape_cast %52 : vector<128xf32> to vector<128x1xf32>
      %54 = arith.cmpf oge, %47, %53 : vector<128x1xf32>
      %55 = arith.extui %54 : vector<128x1xi1> to vector<128x1xi32>
      %56 = arith.sitofp %55 : vector<128x1xi32> to vector<128x1xf32>
      %c0_i32_36 = arith.constant 0 : i32
      %57 = vector.broadcast %c0_i32_36 : i32 to vector<128x128xi32>
      %58 = arith.cmpi eq, %41, %57 : vector<128x128xi32>
      %c1_i32_37 = arith.constant 1 : i32
      %59 = vector.broadcast %c1_i32_37 : i32 to vector<128x128xi32>
      %60 = arith.cmpi eq, %41, %59 : vector<128x128xi32>
      %cst_38 = arith.constant 1.000000e+00 : f32
      %61 = vector.broadcast %cst_38 : f32 to vector<128x1xf32>
      %62 = arith.subf %61, %56 : vector<128x1xf32>
      %cst_39 = arith.constant 0.000000e+00 : f32
      %63 = vector.shape_cast %62 : vector<128x1xf32> to vector<128x1xf32>
      %64 = vector.broadcast %63 : vector<128x1xf32> to vector<128x128xf32>
      %65 = vector.broadcast %cst_39 : f32 to vector<128x128xf32>
      %66 = arith.select %60, %64, %65 : vector<128x128xi1>, vector<128x128xf32>
      %67 = vector.shape_cast %56 : vector<128x1xf32> to vector<128x1xf32>
      %68 = vector.broadcast %67 : vector<128x1xf32> to vector<128x128xf32>
      %69 = arith.select %58, %68, %66 : vector<128x128xi1>, vector<128x128xf32>
      %c0_40 = arith.constant 0 : index
      %c0_41 = arith.constant 0 : index
      %70 = vector.load %arg11[%c0_40, %c0_41] : memref<128x128xf32, #tpu.memory_space<vmem>>, vector<128x128xf32>
      tpu.vector_store %arg11[%c0_40, %c0_41], %69 {strides = array<i32>} : memref<128x128xf32, #tpu.memory_space<vmem>>, vector<128x128xf32>,
    } else {
    }
    return
  }
  func.func @transform_0(%arg0: i32) -> (i32, i32) {
    %c0_i32 = arith.constant 0 : i32
    %c0_i32_0 = arith.constant 0 : i32
    return %arg0, %c0_i32 : i32, i32
  }
  func.func @transform_1(%arg0: i32) -> (i32, i32) {
    %c0_i32 = arith.constant 0 : i32
    %c0_i32_0 = arith.constant 0 : i32
    return %arg0, %c0_i32 : i32, i32
  }
  func.func @transform_2(%arg0: i32) -> (i32, i32) {
    %c0_i32 = arith.constant 0 : i32
    %c0_i32_0 = arith.constant 0 : i32
    %c0_i32_1 = arith.constant 0 : i32
    return %c0_i32, %c0_i32_0 : i32, i32
  }
  func.func @transform_3(%arg0: i32) -> (i32, i32) {
    %c0_i32 = arith.constant 0 : i32
    %c0_i32_0 = arith.constant 0 : i32
    %c0_i32_1 = arith.constant 0 : i32
    return %c0_i32, %c0_i32_0 : i32, i32
  }
  func.func @transform_4(%arg0: i32) -> (i32, i32) {
    %c0_i32 = arith.constant 0 : i32
    %c0_i32_0 = arith.constant 0 : i32
    %c0_i32_1 = arith.constant 0 : i32
    return %c0_i32, %c0_i32_0 : i32, i32
  }
  func.func @transform_5(%arg0: i32) -> (i32, i32) {
    %c0_i32 = arith.constant 0 : i32
    %c0_i32_0 = arith.constant 0 : i32
    %c0_i32_1 = arith.constant 0 : i32
    return %c0_i32, %c0_i32_0 : i32, i32
  }
  func.func @transform_6(%arg0: i32) -> (i32, i32) {
    %c0_i32 = arith.constant 0 : i32
    %c0_i32_0 = arith.constant 0 : i32
    %c0_i32_1 = arith.constant 0 : i32
    return %c0_i32, %c0_i32_0 : i32, i32
  }
  func.func @transform_7(%arg0: i32) -> (i32, i32) {
    %c0_i32 = arith.constant 0 : i32
    %c0_i32_0 = arith.constant 0 : i32
    %c0_i32_1 = arith.constant 0 : i32
    return %c0_i32, %c0_i32_0 : i32, i32
  }
  func.func @transform_8(%arg0: i32) -> (i32, i32) {
    %c0_i32 = arith.constant 0 : i32
    %c0_i32_0 = arith.constant 0 : i32
    %c0_i32_1 = arith.constant 0 : i32
    return %c0_i32, %c0_i32_0 : i32, i32
  }
  func.func @transform_9(%arg0: i32) -> i32 {
    %c0_i32 = arith.constant 0 : i32
    %c0_i32_0 = arith.constant 0 : i32
    return %c0_i32 : i32
  }
  func.func @transform_10(%arg0: i32) -> (i32, i32) {
    %c0_i32 = arith.constant 0 : i32
    %c0_i32_0 = arith.constant 0 : i32
    %c0_i32_1 = arith.constant 0 : i32
    return %c0_i32, %c0_i32_0 : i32, i32
  }
}

</mosaic_0001>

<bundles_post_ra>
// kernel: tpu_custom_call.1
= control target key start
LH: loop header
LB: loop body
LE: loop exit
PB: predicated region body
PF: predicated region fallthrough
CT: control target
= control target key end

     0   :  { %s2160_s0 = inlined_call_operand.vmem [shape: s32[16,1], index: 0, kind: input, shape index: {}]   ;;  %s2161_s1 = inlined_call_operand.vmem [shape: f32[16,8], index: 1, kind: input, shape index: {}]   ;;  %s2162_s2 = inlined_call_operand.vmem [shape: f32[8,32], index: 2, kind: input, shape index: {}]   ;;  %s2163_s3 = inlined_call_operand.vmem [shape: f32[1,32], index: 3, kind: input, shape index: {}]   ;;  %s2164_s4 = inlined_call_operand.vmem [shape: f32[32,32], index: 4, kind: input, shape index: {}]   ;;  %s2165_s5 = inlined_call_operand.vmem [shape: f32[1,32], index: 5, kind: input, shape index: {}]   ;;  %s2166_s6 = inlined_call_operand.hbm [shape: f32[32,128], index: 6, kind: input, shape index: {}]   ;;  %s2167_s7 = inlined_call_operand.vmem [shape: f32[1,128], index: 7, kind: input, shape index: {}]   ;;  %s2168_s8 = inlined_call_operand.hbm [shape: f32[128,128], index: 8, kind: input, shape index: {}]   ;;  %s2169_s9 = inlined_call_operand.<no memory space> [shape: f32[1], index: 9, kind: input, shape index: {}]   ;;  %s2170_s10 = inlined_call_operand.hbm [shape: f32[128,128], index: 10, kind: output, shape index: {}]  }
   0x1   :  { %15 = sst [smem:[#allocation3]] %s2169_s9 }
   0x2   :  { %16 = vsyncpa [#allocation5], 0 }
   0x3   :  { %17 = vsyncpa [#allocation8], 0 }
   0x4   :  { %18 = vsyncpa [#allocation6], 0  ;;  %s1825_s15 = smov 0  }
   0x5 LB: > { %s1831_s16 = sadd.s32 4294967295, %s1753_s15   ;;  %p1416_p0 = scmp.ge.s32.totalorder %s1753_s15, 1  ;;  %s1753_s15 = sphi %s1825_s15, %s24_s15  }
   0x6   : > { %p270_p1 = scmp.lt.s32.totalorder %s1753_s15, 3  ;;  %s1755_s9 = smov [#allocation4]  }
   0x7   : > { %s294_s17 = sshll.u32 %s1755_s9, 4  ;;  %p1632_p4 = scmp.eq.s32.totalorder %s1831_s16, 0  ;;  %s295_s17 = int_to_ptr.vmem [resolvable:$true] %s294_s17 }
   0x8   : > { %p1836_p3 = pnand %p1416_p0, %p270_p1  ;;  %s1756_s19 = smov [#allocation7]  }
   0x9   : > { %s310_s20 = sshll.u32 %s1756_s19, 4  ;;  %s1670_s22 = scalar_lea.vmem %s295_s17, 512  ;;  %s311_s20 = int_to_ptr.vmem [resolvable:$true] %s310_s20 }
   0xa   : > { %p1625_p5 = pneg %p1836_p3  ;;  %p1671_p8 = scmp.ne.s32.totalorder %s295_s17, %s1670_s22 }
   0xb   : > { %p1678_p11 = scmp.lt.s32.totalorder %s295_s17, %s295_s17  ;;  %p1679_p12 = scmp.lt.s32.totalorder %s1670_s22, %s1670_s22 }
   0xc   : > { %p1845_p6 = pnand %p1632_p4, %p1625_p5 }
   0xd   : > { %p1680_p13 = por %p1679_p12, %p1678_p11 }
   0xe   : > { %p1661_p7 = pneg %p1845_p6 }
  0x10   : > { %p1673_p9 = pnand %p1671_p8, %p1661_p7 }
  0x12   : > { %p1674_p10 = pneg %p1673_p9 }
  0x14   : > { %p1681_p0 = pnand %p1680_p13, %p1674_p10 }
  0x16   : > { %1684 = shalt.err (!%p1681_p0)
}
  0x17   : > { %s1757_s23 = smov 128   ;;  %s1758_s24 = smov 8  }
  0x18   : > { %1628 = dma.hbm_to_vmem [thread:$0]  (!%p1845_p6), %s2166_s6, 512, %s295_s17, [#allocation5], %s1757_s23, %s1757_s23, %s1758_s24  }
  0x19   : > { %s1696_s27 = scalar_lea.vmem %s311_s20, 2048  ;;  %p1704_p9 = scmp.lt.s32.totalorder %s311_s20, %s311_s20 }
  0x1a   : > { %p1697_p1 = scmp.ne.s32.totalorder %s311_s20, %s1696_s27  ;;  %p1705_p2 = scmp.lt.s32.totalorder %s1696_s27, %s1696_s27 }
  0x1c   : > { %p1699_p5 = pnand %p1697_p1, %p1661_p7  ;;  %p1706_p11 = por %p1705_p2, %p1704_p9 }
  0x1e   : > { %p1700_p8 = pneg %p1699_p5 }
  0x20   : > { %p1707_p10 = pnand %p1706_p11, %p1700_p8 }
  0x22   : > { %1710 = shalt.err (!%p1707_p10)
}
  0x23   : > { %1631 = dma.hbm_to_vmem [thread:$0]  (!%p1845_p6), %s2168_s8, 2048, %s311_s20, [#allocation8], %s1757_s23, %s1757_s23, %s1758_s24  }
  0x24   : > { %343 = sbr.rel (%p1836_p3) target bundleno = 1102 (0x44e), region = 60 }
  0x29   : > { %1740 = dma.done.wait (%p1632_p4), [#allocation5], 512  }
  0x2a   : > { %1742 = vsyncadd (%p1632_p4), [#allocation5], 4294966784 }
  0x2b   : > { %1744 = dma.done.wait (%p1632_p4), [#allocation8], 2048  }
  0x2c   : > { %1746 = vsyncadd (%p1632_p4), [#allocation8], 4294965248  ;;  %p383_p2 = scmp.lt.s32.totalorder %s1831_s16, 1  ;;  %p2173_p3 = scmp.ne.s32.totalorder %s1831_s16, 0 }
  0x2e   : > { %s384_s30 = scalar_select %p383_p2, %s1831_s16, 1 }
  0x2f   : > { %394 = sbr.rel (%p2173_p3) target bundleno = 61 (0x3d), region = 72 }
  0x30   : > { %s1423_s11 = sshll.u32 %s384_s30, 3 }
  0x31   : > { %s386_s14 = scalar_lea.vmem %s2160_s0, %s1423_s11  ;;  %s390_s18 = scalar_lea.vmem %s2161_s1, %s1423_s11 }
  0x34   : > { %vm395_vm0 = vcmask 261120   ;;  %v1759_v0 = vmov 0.0  }
  0x35   : > { %396 = vst.msk [vmem:[#allocation2] sm:$0xff] %vm395_vm0, %v1759_v0  ;;  %397 = vst.msk [vmem:[#allocation2 + $0x8] sm:$0xff] %vm395_vm0, %v1759_v0 }
  0x36   : > { %398 = vst.msk [vmem:[#allocation2 + $0x10] sm:$0xff] %vm395_vm0, %v1759_v0  ;;  %399 = vst.msk [vmem:[#allocation2 + $0x18] sm:$0xff] %vm395_vm0, %v1759_v0 }
  0x37   : > { %400 = vst.msk [vmem:[#allocation2 + $0x20] sm:$0xff] %vm395_vm0, %v1759_v0  ;;  %401 = vst.msk [vmem:[#allocation2 + $0x28] sm:$0xff] %vm395_vm0, %v1759_v0 }
  0x38   : > { %402 = vst.msk [vmem:[#allocation2 + $0x30] sm:$0xff] %vm395_vm0, %v1759_v0  ;;  %403 = vst.msk [vmem:[#allocation2 + $0x38] sm:$0xff] %vm395_vm0, %v1759_v0 }
  0x39   : > { %404 = vst.msk [vmem:[#allocation2 + $0x40] sm:$0xff] %vm395_vm0, %v1759_v0  ;;  %405 = vst.msk [vmem:[#allocation2 + $0x48] sm:$0xff] %vm395_vm0, %v1759_v0 }
  0x3a   : > { %406 = vst.msk [vmem:[#allocation2 + $0x50] sm:$0xff] %vm395_vm0, %v1759_v0  ;;  %407 = vst.msk [vmem:[#allocation2 + $0x58] sm:$0xff] %vm395_vm0, %v1759_v0 }
  0x3b   : > { %408 = vst.msk [vmem:[#allocation2 + $0x60] sm:$0xff] %vm395_vm0, %v1759_v0  ;;  %409 = vst.msk [vmem:[#allocation2 + $0x68] sm:$0xff] %vm395_vm0, %v1759_v0 }
  0x3c   : > { %410 = vst.msk [vmem:[#allocation2 + $0x70] sm:$0xff] %vm395_vm0, %v1759_v0  ;;  %411 = vst.msk [vmem:[#allocation2 + $0x78] sm:$0xff] %vm395_vm0, %v1759_v0 }
  0x3d PF: > { %v413_v1 = vld [vmem:[%s2162_s2] sm:$0xff]  ;;  %vm421_vm1 = vcmask 64512   ;;  %v1760_v3 = vmov 0.0   ;;  %vm1761_vm2 = vmmov 0   ;;  %v1762_v5 = vmov 0   ;;  %v503_v6 = vld [vmem:[%s2164_s4 + $0x18] sm:$0xff] }
  0x3e   : > { %v412_v2 = vld [vmem:[%s390_s18] sm:$0xff]  ;;  %1529 = vmatprep.subr.mxu0 %v1760_v3  ;;  %1531 = vmatprep.mubr.msk.f32.mxu0 %vm1761_vm2, %v1760_v3  ;;  %v502_v7 = vld [vmem:[%s2164_s4 + $0x10] sm:$0xff]  ;;  %v501_v8 = vld [vmem:[%s2164_s4 + $0x8] sm:$0xff]  ;;  %v586_v10 = vlaneseq  ;;  %s495_s29 = sld [smem:[#allocation3]]  ;;  %vm511_vm5 = vcmask 261120   ;;  %p1447_p4 = scmp.ne.s32.totalorder %s1831_s16, 1 }
  0x3f   : > { %v585_v4 = vld [vmem:[%s386_s14] sm:$0xff]  ;;  %1530 = vmatpush3.msra.mxu0 %v413_v1  ;;  %1658 = vset.pattern.permute.xlu0 %v1762_v5  ;;  %v595_v41 = vld [vmem:[#allocation2 + $0x8] sm:$0xff]  ;;  %v597_v51 = vld [vmem:[#allocation2 + $0x18] sm:$0xff] }
  0x40   : > { %1532 = vmatmul.mubr.msk.f32.vlgmr.msra.gmra.mxu0 %vm421_vm1, %v412_v2  ;;  %589 = vperm.xlu0 %1658, %v585_v4   ;;  %v500_v9 = vld [vmem:[%s2164_s4] sm:$0xff]  ;;  %v1919_v11 = vand.u32 127, %v586_v10  ;;  %v596_v56 = vld [vmem:[#allocation2 + $0x10] sm:$0xff]  ;;  %v599_v62 = vld [vmem:[#allocation2 + $0x28] sm:$0xff] }
  0x41   : > { %1534 = vmatprep.subr.mxu1 %v1760_v3  ;;  %1542 = vmatprep.mubr.msk.f32.mxu1 %vm1761_vm2, %v1760_v3  ;;  %v1426_v14 = vld [vmem:[%s2163_s3] ss:$0 sm:$0xff]  ;;  %v605_v42 = vld [vmem:[#allocation2 + $0x58] sm:$0xff]  ;;  %v604_v46 = vld [vmem:[#allocation2 + $0x50] sm:$0xff] }
  0x42   : > { %1535 = vmatpush3.msra.mxu1 %v503_v6  ;;  %v1428_v34 = vld [vmem:[%s2165_s5] ss:$0 sm:$0xff]  ;;  %v607_v52 = vld [vmem:[#allocation2 + $0x68] sm:$0xff]  ;;  %v601_v10 = vld [vmem:[#allocation2 + $0x38] sm:$0xff] }
  0x43   : > { %1536 = vmatprep.subr.mxu1 %v1760_v3  ;;  %v594_v45 = vld [vmem:[#allocation2] sm:$0xff]  ;;  %v609_v0 = vld [vmem:[#allocation2 + $0x78] sm:$0xff]  ;;  %v608_v6 = vld [vmem:[#allocation2 + $0x70] sm:$0xff] }
  0x44   : > { %1537 = vmatpush3.msra.mxu1 %v502_v7  ;;  %v497_v16 = vstv %s495_s29  ;;  %v606_v58 = vld [vmem:[#allocation2 + $0x60] sm:$0xff] }
  0x45   : > { %1538 = vmatprep.subr.mxu1 %v1760_v3  ;;  %v598_v4 = vld [vmem:[#allocation2 + $0x20] sm:$0xff] }
  0x46   : > { %1539 = vmatpush3.msra.mxu1 %v501_v8 }
  0x47   : > { %1540 = vmatprep.subr.mxu1 %v1760_v3 }
  0x48   : > { %1541 = vmatpush3.msra.mxu1 %v500_v9 }
  0xbb   : > { %v590_v12 = vpop.permute.xlu0 %589 }
  0xbc   : > { %vm591_vm3 = vcmp.eq.s32.totalorder %v1919_v11, %v590_v12 }
  0xbd   : > { %v1430_v13 = vsel %vm591_vm3, 1.0, %v1760_v3 }
  0xbe   : > { %610 = vxpose.xlu0.b32.start.end [1/1] (short) %v1430_v13, 128 }
 0x100   : > { %v491_v15 = vpop.f32.mrf.mxu0 }
 0x101   : > { %v492_v17 = vadd.f32 %v1426_v14, %v491_v15 }
 0x102   : > { %v1533_v18 = vpop.f32.mrf.mxu0 }
 0x103   : > { %vm496_vm4 = vcmp.ge.f32.partialorder %v492_v17, 0.0  ;;  %v498_v19 = vmul.f32 %v497_v16, %v492_v17  ;;  %v600_v16 = vld [vmem:[#allocation2 + $0x30] sm:$0xff] }
 0x105   : > { %v499_v20 = vsel %vm496_vm4, %v492_v17, %v498_v19  ;;  %v603_v19 = vld [vmem:[#allocation2 + $0x48] sm:$0xff] }
 0x106   : > { %1543 = vmatmul.mubr.msk.f32.vlgmr.msra.gmra.mxu1 %vm511_vm5, %v499_v20 }
 0x13a   : > { %v626_v21 = vpop.trf.xlu0 }
 0x13b   : > { %1547 = vmatprep.mubr.msk.f32.mxu0 %vm421_vm1, %v626_v21 }
 0x13e   : > { %v627_v22 = vpop.trf.xlu0 }
 0x142   : > { %v628_v23 = vpop.trf.xlu0 }
 0x146   : > { %v629_v24 = vpop.trf.xlu0 }
 0x14a   : > { %v630_v25 = vpop.trf.xlu0 }
 0x14e   : > { %v631_v26 = vpop.trf.xlu0 }
 0x152   : > { %v632_v27 = vpop.trf.xlu0 }
 0x156   : > { %v633_v28 = vpop.trf.xlu0 }
 0x15a   : > { %v634_v29 = vpop.trf.xlu0 }
 0x15e   : > { %v635_v30 = vpop.trf.xlu0 }
 0x162   : > { %v636_v31 = vpop.trf.xlu0 }
 0x163   : > { %1562 = vmatprep.mubr.msk.f32.mxu1 %vm421_vm1, %v636_v31 }
 0x166   : > { %v637_v32 = vpop.trf.xlu0 }
 0x16a   : > { %v638_v33 = vpop.trf.xlu0 }
 0x16e   : > { %v639_v35 = vpop.trf.xlu0 }
 0x172   : > { %v640_v39 = vpop.trf.xlu0 }
 0x176   : > { %v641_v40 = vpop.trf.xlu0 }
 0x1c6   : > { %v581_v36 = vpop.f32.mrf.mxu1 }
 0x1c7   : > { %v582_v37 = vadd.f32 %v1428_v34, %v581_v36 }
 0x1c8   : > { %v1544_v38 = vpop.f32.mrf.mxu1 }
 0x1c9   : > { %1545 = vmatprep.subr.mxu0 %v582_v37  ;;  %1603 = vmatprep.subr.mxu1 %v582_v37 }
 0x1ca   : > { %1546 = vmatpush3.msra.mxu0 %v582_v37  ;;  %1604 = vmatpush3.msra.mxu1 %v582_v37 }
 0x1cb   : > { %1548 = vmatmul.mubr.msk.f32.vlgmr.msra.gmra.mxu0 %vm421_vm1, %v627_v22  ;;  %1563 = vmatmul.mubr.msk.f32.vlgmr.msra.gmra.mxu1 %vm421_vm1, %v637_v32  ;;  %v602_v22 = vld [vmem:[#allocation2 + $0x40] sm:$0xff] }
 0x1cc   : > { %1550 = vmatprep.mubr.msk.f32.mxu0 %vm421_vm1, %v628_v23  ;;  %1565 = vmatprep.mubr.msk.f32.mxu1 %vm421_vm1, %v638_v33 }
 0x1cf   : > { %1551 = vmatmul.mubr.msk.f32.gmra.mxu0 %vm421_vm1, %v629_v24  ;;  %1566 = vmatmul.mubr.msk.f32.gmra.mxu1 %vm421_vm1, %v639_v35 }
 0x1d0   : > { %1553 = vmatprep.mubr.msk.f32.mxu0 %vm421_vm1, %v630_v25  ;;  %1568 = vmatprep.mubr.msk.f32.mxu1 %vm421_vm1, %v640_v39 }
 0x1d3   : > { %1554 = vmatmul.mubr.msk.f32.gmra.mxu0 %vm421_vm1, %v631_v26  ;;  %1569 = vmatmul.mubr.msk.f32.gmra.mxu1 %vm421_vm1, %v641_v40 }
 0x1d4   : > { %1556 = vmatprep.mubr.msk.f32.mxu0 %vm421_vm1, %v632_v27 }
 0x1d7   : > { %1557 = vmatmul.mubr.msk.f32.gmra.mxu0 %vm421_vm1, %v633_v28 }
 0x1d8   : > { %1559 = vmatprep.mubr.msk.f32.mxu0 %vm421_vm1, %v634_v29 }
 0x1db   : > { %1560 = vmatmul.mubr.msk.f32.gmra.mxu0 %vm421_vm1, %v635_v30 }
 0x28b   : > { %v1549_v43 = vpop.f32.mrf.mxu0  ;;  %v1564_v44 = vpop.f32.mrf.mxu1 }
 0x28c   : > { %v836_v47 = vadd.f32 %v1549_v43, %v595_v41  ;;  %v846_v48 = vadd.f32 %v1564_v44, %v605_v42 }
 0x28d   : > { %v756_v49 = vpop.f32.mrf.mxu0  ;;  %v806_v50 = vpop.f32.mrf.mxu1 }
 0x28e   : > { %852 = vst.msk [vmem:[#allocation2 + $0x8] sm:$0xff] %vm511_vm5, %v836_v47  ;;  %862 = vst.msk [vmem:[#allocation2 + $0x58] sm:$0xff] %vm511_vm5, %v846_v48  ;;  %v835_v53 = vadd.f32 %v756_v49, %v594_v45  ;;  %v845_v54 = vadd.f32 %v806_v50, %v604_v46 }
 0x28f   : > { %v1552_v55 = vpop.f32.mrf.mxu0  ;;  %v1567_v57 = vpop.f32.mrf.mxu1 }
 0x290   : > { %851 = vst.msk [vmem:[#allocation2] sm:$0xff] %vm511_vm5, %v835_v53  ;;  %861 = vst.msk [vmem:[#allocation2 + $0x50] sm:$0xff] %vm511_vm5, %v845_v54  ;;  %v838_v59 = vadd.f32 %v1552_v55, %v597_v51  ;;  %v848_v60 = vadd.f32 %v1567_v57, %v607_v52 }
 0x291   : > { %v766_v61 = vpop.f32.mrf.mxu0  ;;  %v816_v63 = vpop.f32.mrf.mxu1 }
 0x292   : > { %854 = vst.msk [vmem:[#allocation2 + $0x18] sm:$0xff] %vm511_vm5, %v838_v59  ;;  %v837_v1 = vadd.f32 %v766_v61, %v596_v56  ;;  %864 = vst.msk [vmem:[#allocation2 + $0x68] sm:$0xff] %vm511_vm5, %v848_v60  ;;  %v847_v2 = vadd.f32 %v816_v63, %v606_v58 }
 0x293   : > { %v1555_v3 = vpop.f32.mrf.mxu0  ;;  %v1570_v5 = vpop.f32.mrf.mxu1 }
 0x294   : > { %853 = vst.msk [vmem:[#allocation2 + $0x10] sm:$0xff] %vm511_vm5, %v837_v1  ;;  %v840_v7 = vadd.f32 %v1555_v3, %v599_v62  ;;  %863 = vst.msk [vmem:[#allocation2 + $0x60] sm:$0xff] %vm511_vm5, %v847_v2  ;;  %v850_v8 = vadd.f32 %v1570_v5, %v609_v0 }
 0x295   : > { %v776_v9 = vpop.f32.mrf.mxu0  ;;  %v826_v12 = vpop.f32.mrf.mxu1 }
 0x296   : > { %856 = vst.msk [vmem:[#allocation2 + $0x28] sm:$0xff] %vm511_vm5, %v840_v7  ;;  %v839_v13 = vadd.f32 %v776_v9, %v598_v4  ;;  %866 = vst.msk [vmem:[#allocation2 + $0x78] sm:$0xff] %vm511_vm5, %v850_v8  ;;  %v849_v14 = vadd.f32 %v826_v12, %v608_v6 }
 0x297   : > { %v1558_v15 = vpop.f32.mrf.mxu0 }
 0x298   : > { %855 = vst.msk [vmem:[#allocation2 + $0x20] sm:$0xff] %vm511_vm5, %v839_v13  ;;  %v842_v17 = vadd.f32 %v1558_v15, %v601_v10  ;;  %865 = vst.msk [vmem:[#allocation2 + $0x70] sm:$0xff] %vm511_vm5, %v849_v14 }
 0x299   : > { %v786_v18 = vpop.f32.mrf.mxu0 }
 0x29a   : > { %858 = vst.msk [vmem:[#allocation2 + $0x38] sm:$0xff] %vm511_vm5, %v842_v17  ;;  %v841_v20 = vadd.f32 %v786_v18, %v600_v16 }
 0x29b   : > { %v1561_v21 = vpop.f32.mrf.mxu0 }
 0x29c   : > { %857 = vst.msk [vmem:[#allocation2 + $0x30] sm:$0xff] %vm511_vm5, %v841_v20  ;;  %v844_v23 = vadd.f32 %v1561_v21, %v603_v19  ;;  %870 = sbr.rel (%p1447_p4) target bundleno = 1086 (0x43e), region = 76 }
 0x29d   : > { %v796_v24 = vpop.f32.mrf.mxu0 }
 0x29e   : > { %860 = vst.msk [vmem:[#allocation2 + $0x48] sm:$0xff] %vm511_vm5, %v844_v23  ;;  %v843_v25 = vadd.f32 %v796_v24, %v602_v22 }
 0x2a0   : > { %859 = vst.msk [vmem:[#allocation2 + $0x40] sm:$0xff] %vm511_vm5, %v843_v25 }
 0x2a1   : > { %v890_v26 = vld [vmem:[#allocation4 + $0x18] sm:$0xff]  ;;  %v889_v27 = vld [vmem:[#allocation4 + $0x10] sm:$0xff]  ;;  %v888_v28 = vld [vmem:[#allocation4 + $0x8] sm:$0xff]  ;;  %vm1123_vm6 = vcmp.eq.s32.totalorder %v1919_v11, 0  ;;  %vm1172_vm7 = vcmp.eq.s32.totalorder %v1919_v11, 1 }
 0x2a2   : > { %1571 = vmatprep.subr.mxu0 %v890_v26  ;;  %1605 = vmatprep.subr.mxu1 %v890_v26  ;;  %v887_v29 = vld [vmem:[#allocation4] sm:$0xff]  ;;  %v872_v32 = vld [vmem:[#allocation2 + $0x8] sm:$0xff]  ;;  %v873_v34 = vld [vmem:[#allocation2 + $0x10] sm:$0xff] }
 0x2a3   : > { %1572 = vmatpush3.msra.mxu0 %v890_v26  ;;  %1609 = vmatpush3.msra.mxu1 %v890_v26  ;;  %v871_v30 = vld [vmem:[#allocation2] sm:$0xff]  ;;  %v881_v35 = vld [vmem:[#allocation2 + $0x50] sm:$0xff]  ;;  %v874_v36 = vld [vmem:[#allocation2 + $0x18] sm:$0xff] }
 0x2a4   : > { %1573 = vmatprep.subr.mxu0 %v889_v27  ;;  %1606 = vmatprep.subr.mxu1 %v889_v27  ;;  %v882_v37 = vld [vmem:[#allocation2 + $0x58] sm:$0xff]  ;;  %v875_v38 = vld [vmem:[#allocation2 + $0x20] sm:$0xff]  ;;  %v876_v40 = vld [vmem:[#allocation2 + $0x28] sm:$0xff] }
 0x2a5   : > { %1574 = vmatpush3.msra.mxu0 %v889_v27  ;;  %1610 = vmatpush3.msra.mxu1 %v889_v27  ;;  %v880_v33 = vld [vmem:[#allocation2 + $0x48] sm:$0xff]  ;;  %v883_v39 = vld [vmem:[#allocation2 + $0x60] sm:$0xff]  ;;  %v877_v42 = vld [vmem:[#allocation2 + $0x30] sm:$0xff] }
 0x2a6   : > { %1575 = vmatprep.subr.mxu0 %v888_v28  ;;  %1607 = vmatprep.subr.mxu1 %v888_v28  ;;  %v884_v41 = vld [vmem:[#allocation2 + $0x68] sm:$0xff]  ;;  %v885_v43 = vld [vmem:[#allocation2 + $0x70] sm:$0xff]  ;;  %v878_v44 = vld [vmem:[#allocation2 + $0x38] sm:$0xff] }
 0x2a7   : > { %1576 = vmatpush3.msra.mxu0 %v888_v28  ;;  %1611 = vmatpush3.msra.mxu1 %v888_v28  ;;  %v879_v31 = vld [vmem:[#allocation2 + $0x40] sm:$0xff]  ;;  %v886_v45 = vld [vmem:[#allocation2 + $0x78] sm:$0xff]  ;;  %v1100_v49 = vld [vmem:[#allocation7 + $0x48] sm:$0xff] }
 0x2a8   : > { %1577 = vmatprep.subr.mxu0 %v887_v29  ;;  %1608 = vmatprep.subr.mxu1 %v887_v29  ;;  %v1981_v46 = vld [vmem:[%s2167_s7] ss:$0 sm:$0xff]  ;;  %v1092_v50 = vld [vmem:[#allocation7 + $0x8] sm:$0xff]  ;;  %v1094_v2 = vld [vmem:[#allocation7 + $0x18] sm:$0xff] }
 0x2a9   : > { %1578 = vmatpush3.msra.mxu0 %v887_v29  ;;  %1612 = vmatpush3.msra.mxu1 %v887_v29  ;;  %v1091_v58 = vld [vmem:[#allocation7] sm:$0xff]  ;;  %v1102_v9 = vld [vmem:[#allocation7 + $0x58] sm:$0xff]  ;;  %v1101_v19 = vld [vmem:[#allocation7 + $0x50] sm:$0xff] }
 0x2aa   : > { %1579 = vmatprep.mubr.msk.f32.mxu0 %vm511_vm5, %v871_v30  ;;  %1591 = vmatprep.mubr.msk.f32.mxu1 %vm511_vm5, %v879_v31  ;;  %v1099_v0 = vld [vmem:[#allocation7 + $0x40] sm:$0xff]  ;;  %v1093_v25 = vld [vmem:[#allocation7 + $0x10] sm:$0xff] }
 0x2ab   : > { %1580 = vmatmul.mubr.msk.f32.vlgmr.msra.gmra.mxu0 %vm511_vm5, %v872_v32  ;;  %1592 = vmatmul.mubr.msk.f32.vlgmr.msra.gmra.mxu1 %vm511_vm5, %v880_v33 }
 0x2ac   : > { %1582 = vmatprep.mubr.msk.f32.mxu0 %vm511_vm5, %v873_v34  ;;  %1594 = vmatprep.mubr.msk.f32.mxu1 %vm511_vm5, %v881_v35 }
 0x2af   : > { %1583 = vmatmul.mubr.msk.f32.gmra.mxu0 %vm511_vm5, %v874_v36  ;;  %1595 = vmatmul.mubr.msk.f32.gmra.mxu1 %vm511_vm5, %v882_v37  ;;  %v1096_v36 = vld [vmem:[#allocation7 + $0x28] sm:$0xff]  ;;  %v1095_v37 = vld [vmem:[#allocation7 + $0x20] sm:$0xff] }
 0x2b0   : > { %1585 = vmatprep.mubr.msk.f32.mxu0 %vm511_vm5, %v875_v38  ;;  %1597 = vmatprep.mubr.msk.f32.mxu1 %vm511_vm5, %v883_v39 }
 0x2b3   : > { %1586 = vmatmul.mubr.msk.f32.gmra.mxu0 %vm511_vm5, %v876_v40  ;;  %1598 = vmatmul.mubr.msk.f32.gmra.mxu1 %vm511_vm5, %v884_v41 }
 0x2b4   : > { %1588 = vmatprep.mubr.msk.f32.mxu0 %vm511_vm5, %v877_v42  ;;  %1600 = vmatprep.mubr.msk.f32.mxu1 %vm511_vm5, %v885_v43 }
 0x2b7   : > { %1589 = vmatmul.mubr.msk.f32.gmra.mxu0 %vm511_vm5, %v878_v44  ;;  %1601 = vmatmul.mubr.msk.f32.gmra.mxu1 %vm511_vm5, %v886_v45  ;;  %v1104_v44 = vld [vmem:[#allocation7 + $0x68] sm:$0xff]  ;;  %v1103_v45 = vld [vmem:[#allocation7 + $0x60] sm:$0xff] }
 0x36b   : > { %v1581_v47 = vpop.f32.mrf.mxu0  ;;  %v1593_v48 = vpop.f32.mrf.mxu1 }
 0x36c   : > { %v1018_v51 = vadd.f32 %v1581_v47, %v1981_v46  ;;  %v1058_v52 = vadd.f32 %v1593_v48, %v1981_v46 }
 0x36d   : > { %v1012_v53 = vpop.f32.mrf.mxu0  ;;  %v1052_v54 = vpop.f32.mrf.mxu1 }
 0x36e   : > { %v1013_v55 = vadd.f32 %v1981_v46, %v1012_v53  ;;  %v1116_v56 = vadd.f32 %v1100_v49, %v1058_v52  ;;  %v1108_v57 = vadd.f32 %v1092_v50, %v1018_v51  ;;  %v1053_v59 = vadd.f32 %v1981_v46, %v1052_v54 }
 0x36f   : > { %v1584_v62 = vpop.f32.mrf.mxu0  ;;  %v1596_v6 = vpop.f32.mrf.mxu1 }
 0x370   : > { %v1133_v60 = vsel %vm1123_vm6, %v1116_v56, -inf  ;;  %v1125_v61 = vsel %vm1123_vm6, %v1108_v57, -inf  ;;  %v1107_v63 = vadd.f32 %v1091_v58, %v1013_v55  ;;  %v1028_v1 = vadd.f32 %v1584_v62, %v1981_v46  ;;  %v1097_v62 = vld [vmem:[#allocation7 + $0x30] sm:$0xff] }
 0x371   : > { %1158 = vmax.xlane.f32.xlu1 %v1133_v60  ;;  %1142 = vmax.xlane.f32.xlu0 %v1125_v61  ;;  %v1174_v3 = vsel %vm1172_vm7, %v1108_v57, -inf  ;;  %v1115_v5 = vadd.f32 %v1099_v0, %v1053_v59  ;;  %v1068_v7 = vadd.f32 %v1596_v6, %v1981_v46  ;;  %v1182_v10 = vsel %vm1172_vm7, %v1116_v56, -inf  ;;  %v1062_v13 = vpop.f32.mrf.mxu1  ;;  %v1022_v18 = vpop.f32.mrf.mxu0  ;;  %v1098_v61 = vld [vmem:[#allocation7 + $0x38] sm:$0xff]  ;;  %v1105_v6 = vld [vmem:[#allocation7 + $0x70] sm:$0xff] }
 0x372   : > { %v1124_v4 = vsel %vm1123_vm6, %v1107_v63, -inf  ;;  %v1110_v8 = vadd.f32 %v1094_v2, %v1028_v1  ;;  %v1063_v16 = vadd.f32 %v1981_v46, %v1062_v13  ;;  %v1173_v17 = vsel %vm1172_vm7, %v1107_v63, -inf }
 0x373   : > { %v1132_v12 = vsel %vm1123_vm6, %v1115_v5, -inf  ;;  %v1118_v15 = vadd.f32 %v1102_v9, %v1068_v7  ;;  %v1023_v21 = vadd.f32 %v1981_v46, %v1022_v18  ;;  %v1181_v22 = vsel %vm1172_vm7, %v1115_v5, -inf  ;;  %v1587_v24 = vpop.f32.mrf.mxu0  ;;  %v1599_v29 = vpop.f32.mrf.mxu1  ;;  %v1106_v5 = vld [vmem:[#allocation7 + $0x78] sm:$0xff] }
 0x374   : > { %v1127_v14 = vsel %vm1123_vm6, %v1110_v8, -inf  ;;  %v1117_v23 = vadd.f32 %v1101_v19, %v1063_v16  ;;  %v1176_v26 = vsel %vm1172_vm7, %v1110_v8, -inf  ;;  %v1038_v31 = vadd.f32 %v1587_v24, %v1981_v46 }
 0x375   : > { %1191 = vmax.xlane.f32.xlu1 %v1174_v3  ;;  %1140 = vmax.xlane.f32.xlu0 %v1124_v4  ;;  %v1135_v20 = vsel %vm1123_vm6, %v1118_v15, -inf  ;;  %v1109_v28 = vadd.f32 %v1093_v25, %v1023_v21  ;;  %v1032_v30 = vpop.f32.mrf.mxu0  ;;  %v1184_v32 = vsel %vm1172_vm7, %v1118_v15, -inf  ;;  %v1072_v35 = vpop.f32.mrf.mxu1  ;;  %v1078_v38 = vadd.f32 %v1599_v29, %v1981_v46 }
 0x376   : > { %v1134_v27 = vsel %vm1123_vm6, %v1117_v23, -inf  ;;  %v1033_v33 = vadd.f32 %v1981_v46, %v1032_v30  ;;  %v1073_v39 = vadd.f32 %v1981_v46, %v1072_v35  ;;  %v1183_v41 = vsel %vm1172_vm7, %v1117_v23, -inf }
 0x377   : > { %v1175_v34 = vsel %vm1172_vm7, %v1109_v28, -inf  ;;  %v1126_v40 = vsel %vm1123_vm6, %v1109_v28, -inf  ;;  %v1112_v42 = vadd.f32 %v1096_v36, %v1038_v31  ;;  %v1120_v49 = vadd.f32 %v1104_v44, %v1078_v38  ;;  %v1590_v51 = vpop.f32.mrf.mxu0  ;;  %v1602_v54 = vpop.f32.mrf.mxu1 }
 0x378   : > { %v1111_v43 = vadd.f32 %v1095_v37, %v1033_v33  ;;  %v1119_v50 = vadd.f32 %v1103_v45, %v1073_v39  ;;  %v1048_v56 = vadd.f32 %v1590_v51, %v1981_v46  ;;  %v1088_v63 = vadd.f32 %v1602_v54, %v1981_v46 }
 0x379   : > { %1207 = vmax.xlane.f32.xlu1 %v1182_v10  ;;  %1156 = vmax.xlane.f32.xlu0 %v1132_v12  ;;  %v1129_v47 = vsel %vm1123_vm6, %v1112_v42, -inf  ;;  %v1137_v52 = vsel %vm1123_vm6, %v1120_v49, -inf  ;;  %v1042_v55 = vpop.f32.mrf.mxu0  ;;  %v1178_v58 = vsel %vm1172_vm7, %v1112_v42, -inf  ;;  %v1082_v60 = vpop.f32.mrf.mxu1  ;;  %v1186_v1 = vsel %vm1172_vm7, %v1120_v49, -inf }
 0x37a   : > { %v1128_v48 = vsel %vm1123_vm6, %v1111_v43, -inf  ;;  %v1136_v53 = vsel %vm1123_vm6, %v1119_v50, -inf  ;;  %v1043_v57 = vadd.f32 %v1981_v46, %v1042_v55  ;;  %v1177_v59 = vsel %vm1172_vm7, %v1111_v43, -inf }
 0x37b   : > { %v1083_v0 = vadd.f32 %v1981_v46, %v1082_v60  ;;  %v1185_v2 = vsel %vm1172_vm7, %v1119_v50, -inf  ;;  %v1114_v3 = vadd.f32 %v1098_v61, %v1048_v56  ;;  %v1122_v9 = vadd.f32 %v1106_v5, %v1088_v63 }
 0x37c   : > { %v1113_v4 = vadd.f32 %v1097_v62, %v1043_v57  ;;  %v1763_v21 = vmov 0.0  }
 0x37d   : > { %1146 = vmax.xlane.f32.xlu1 %v1127_v14  ;;  %1189 = vmax.xlane.f32.xlu0 %v1173_v17  ;;  %v1131_v7 = vsel %vm1123_vm6, %v1114_v3, -inf  ;;  %v1121_v46 = vadd.f32 %v1105_v6, %v1083_v0  ;;  %v1139_v10 = vsel %vm1123_vm6, %v1122_v9, -inf  ;;  %v1180_v13 = vsel %vm1172_vm7, %v1114_v3, -inf }
 0x37e   : > { %v1130_v8 = vsel %vm1123_vm6, %v1113_v4, -inf  ;;  %v1179_v14 = vsel %vm1172_vm7, %v1113_v4, -inf  ;;  %v1188_v15 = vsel %vm1172_vm7, %v1122_v9, -inf }
 0x37f   : > { %v1138_v12 = vsel %vm1123_vm6, %v1121_v46, -inf  ;;  %v1187_v16 = vsel %vm1172_vm7, %v1121_v46, -inf }
 0x381   : > { %1162 = vmax.xlane.f32.xlu1 %v1135_v20  ;;  %1205 = vmax.xlane.f32.xlu0 %v1181_v22 }
 0x385   : > { %1195 = vmax.xlane.f32.xlu1 %v1176_v26  ;;  %1160 = vmax.xlane.f32.xlu0 %v1134_v27 }
 0x389   : > { %1211 = vmax.xlane.f32.xlu1 %v1184_v32  ;;  %1193 = vmax.xlane.f32.xlu0 %v1175_v34 }
 0x38d   : > { %1144 = vmax.xlane.f32.xlu1 %v1126_v40  ;;  %1209 = vmax.xlane.f32.xlu0 %v1183_v41 }
 0x391   : > { %1150 = vmax.xlane.f32.xlu1 %v1129_v47  ;;  %1148 = vmax.xlane.f32.xlu0 %v1128_v48 }
 0x395   : > { %1166 = vmax.xlane.f32.xlu1 %v1137_v52  ;;  %1164 = vmax.xlane.f32.xlu0 %v1136_v53 }
 0x399   : > { %1199 = vmax.xlane.f32.xlu1 %v1178_v58  ;;  %1197 = vmax.xlane.f32.xlu0 %v1177_v59 }
 0x39d   : > { %1215 = vmax.xlane.f32.xlu1 %v1186_v1  ;;  %1213 = vmax.xlane.f32.xlu0 %v1185_v2 }
 0x3a1   : > { %1154 = vmax.xlane.f32.xlu1 %v1131_v7  ;;  %1152 = vmax.xlane.f32.xlu0 %v1130_v8 }
 0x3a5   : > { %1170 = vmax.xlane.f32.xlu1 %v1139_v10  ;;  %1168 = vmax.xlane.f32.xlu0 %v1138_v12 }
 0x3a9   : > { %1203 = vmax.xlane.f32.xlu1 %v1180_v13  ;;  %1201 = vmax.xlane.f32.xlu0 %v1179_v14 }
 0x3ad   : > { %1219 = vmax.xlane.f32.xlu1 %v1188_v15  ;;  %1217 = vmax.xlane.f32.xlu0 %v1187_v16 }
 0x3fa   : > { %v1159_v17 = vpop.xlane.xlu1 %1158  ;;  %v1143_v18 = vpop.xlane.xlu0 %1142 }
 0x3fe   : > { %v1192_v19 = vpop.xlane.xlu1 %1191  ;;  %v1141_v20 = vpop.xlane.xlu0 %1140 }
 0x3ff   : > { %vm1222_vm8 = vcmp.ge.f32.partialorder %v1143_v18, %v1192_v19 }
 0x400   : > { %v1466_v22 = vsel %vm1222_vm8, 1.0, %v1763_v21 }
 0x401   : > { %v1270_v23 = vsub.f32 1.0, %v1466_v22 }
 0x402   : > { %v1208_v24 = vpop.xlane.xlu1 %1207  ;;  %v1157_v25 = vpop.xlane.xlu0 %1156 }
 0x403   : > { %v1286_v26 = vsel %vm1172_vm7, %v1270_v23, 0.0  ;;  %vm1230_vm9 = vcmp.ge.f32.partialorder %v1159_v17, %v1208_v24 }
 0x404   : > { %v1302_v27 = vsel %vm1123_vm6, %v1466_v22, %v1286_v26  ;;  %v1474_v28 = vsel %vm1230_vm9, 1.0, %v1763_v21 }
 0x405   : > { %1318 = vst [vmem:[#allocation9 + $0x8] sm:$0xff] %v1302_v27  ;;  %v1278_v29 = vsub.f32 1.0, %v1474_v28 }
 0x406   : > { %v1147_v30 = vpop.xlane.xlu1 %1146  ;;  %v1190_v31 = vpop.xlane.xlu0 %1189 }
 0x407   : > { %v1294_v32 = vsel %vm1172_vm7, %v1278_v29, 0.0  ;;  %vm1221_vm10 = vcmp.ge.f32.partialorder %v1141_v20, %v1190_v31 }
 0x408   : > { %v1310_v33 = vsel %vm1123_vm6, %v1474_v28, %v1294_v32  ;;  %v1465_v34 = vsel %vm1221_vm10, 1.0, %v1763_v21 }
 0x409   : > { %1326 = vst [vmem:[#allocation9 + $0x48] sm:$0xff] %v1310_v33  ;;  %v1269_v35 = vsub.f32 1.0, %v1465_v34 }
 0x40a   : > { %v1163_v36 = vpop.xlane.xlu1 %1162  ;;  %v1206_v37 = vpop.xlane.xlu0 %1205 }
 0x40b   : > { %v1285_v38 = vsel %vm1172_vm7, %v1269_v35, 0.0  ;;  %vm1229_vm11 = vcmp.ge.f32.partialorder %v1157_v25, %v1206_v37 }
 0x40c   : > { %v1301_v39 = vsel %vm1123_vm6, %v1465_v34, %v1285_v38  ;;  %v1473_v40 = vsel %vm1229_vm11, 1.0, %v1763_v21 }
 0x40d   : > { %1317 = vst [vmem:[#allocation9] sm:$0xff] %v1301_v39  ;;  %v1277_v41 = vsub.f32 1.0, %v1473_v40 }
 0x40e   : > { %v1196_v42 = vpop.xlane.xlu1 %1195  ;;  %v1161_v43 = vpop.xlane.xlu0 %1160 }
 0x40f   : > { %v1293_v44 = vsel %vm1172_vm7, %v1277_v41, 0.0  ;;  %vm1224_vm12 = vcmp.ge.f32.partialorder %v1147_v30, %v1196_v42 }
 0x410   : > { %v1309_v45 = vsel %vm1123_vm6, %v1473_v40, %v1293_v44  ;;  %v1468_v47 = vsel %vm1224_vm12, 1.0, %v1763_v21 }
 0x411   : > { %1325 = vst [vmem:[#allocation9 + $0x40] sm:$0xff] %v1309_v45  ;;  %v1272_v48 = vsub.f32 1.0, %v1468_v47 }
 0x412   : > { %v1212_v49 = vpop.xlane.xlu1 %1211  ;;  %v1194_v50 = vpop.xlane.xlu0 %1193 }
 0x413   : > { %v1288_v51 = vsel %vm1172_vm7, %v1272_v48, 0.0  ;;  %vm1232_vm13 = vcmp.ge.f32.partialorder %v1163_v36, %v1212_v49 }
 0x414   : > { %v1304_v52 = vsel %vm1123_vm6, %v1468_v47, %v1288_v51  ;;  %v1476_v53 = vsel %vm1232_vm13, 1.0, %v1763_v21 }
 0x415   : > { %1320 = vst [vmem:[#allocation9 + $0x18] sm:$0xff] %v1304_v52  ;;  %v1280_v54 = vsub.f32 1.0, %v1476_v53 }
 0x416   : > { %v1145_v55 = vpop.xlane.xlu1 %1144  ;;  %v1210_v56 = vpop.xlane.xlu0 %1209 }
 0x417   : > { %v1296_v57 = vsel %vm1172_vm7, %v1280_v54, 0.0  ;;  %vm1223_vm14 = vcmp.ge.f32.partialorder %v1145_v55, %v1194_v50  ;;  %vm1231_vm15 = vcmp.ge.f32.partialorder %v1161_v43, %v1210_v56 }
 0x418   : > { %v1312_v58 = vsel %vm1123_vm6, %v1476_v53, %v1296_v57  ;;  %v1467_v59 = vsel %vm1223_vm14, 1.0, %v1763_v21  ;;  %v1475_v60 = vsel %vm1231_vm15, 1.0, %v1763_v21 }
 0x419   : > { %1328 = vst [vmem:[#allocation9 + $0x58] sm:$0xff] %v1312_v58  ;;  %v1271_v61 = vsub.f32 1.0, %v1467_v59  ;;  %v1279_v62 = vsub.f32 1.0, %v1475_v60 }
 0x41a   : > { %v1151_v63 = vpop.xlane.xlu1 %1150  ;;  %v1149_v0 = vpop.xlane.xlu0 %1148 }
 0x41b   : > { %v1287_v1 = vsel %vm1172_vm7, %v1271_v61, 0.0  ;;  %v1295_v2 = vsel %vm1172_vm7, %v1279_v62, 0.0 }
 0x41c   : > { %v1303_v3 = vsel %vm1123_vm6, %v1467_v59, %v1287_v1  ;;  %v1311_v4 = vsel %vm1123_vm6, %v1475_v60, %v1295_v2 }
 0x41d   : > { %1319 = vst [vmem:[#allocation9 + $0x10] sm:$0xff] %v1303_v3  ;;  %1327 = vst [vmem:[#allocation9 + $0x50] sm:$0xff] %v1311_v4 }
 0x41e   : > { %v1167_v5 = vpop.xlane.xlu1 %1166  ;;  %v1165_v6 = vpop.xlane.xlu0 %1164 }
 0x422   : > { %v1200_v7 = vpop.xlane.xlu1 %1199  ;;  %v1198_v8 = vpop.xlane.xlu0 %1197 }
 0x423   : > { %vm1226_vm0 = vcmp.ge.f32.partialorder %v1151_v63, %v1200_v7  ;;  %vm1225_vm1 = vcmp.ge.f32.partialorder %v1149_v0, %v1198_v8 }
 0x424   : > { %v1470_v9 = vsel %vm1226_vm0, 1.0, %v1763_v21  ;;  %v1469_v46 = vsel %vm1225_vm1, 1.0, %v1763_v21 }
 0x425   : > { %v1274_v10 = vsub.f32 1.0, %v1470_v9  ;;  %v1273_v12 = vsub.f32 1.0, %v1469_v46 }
 0x426   : > { %v1216_v13 = vpop.xlane.xlu1 %1215  ;;  %v1214_v14 = vpop.xlane.xlu0 %1213 }
 0x427   : > { %v1290_v15 = vsel %vm1172_vm7, %v1274_v10, 0.0  ;;  %v1289_v16 = vsel %vm1172_vm7, %v1273_v12, 0.0  ;;  %vm1234_vm2 = vcmp.ge.f32.partialorder %v1167_v5, %v1216_v13  ;;  %vm1233_vm3 = vcmp.ge.f32.partialorder %v1165_v6, %v1214_v14 }
 0x428   : > { %v1306_v17 = vsel %vm1123_vm6, %v1470_v9, %v1290_v15  ;;  %v1305_v18 = vsel %vm1123_vm6, %v1469_v46, %v1289_v16  ;;  %v1478_v19 = vsel %vm1234_vm2, 1.0, %v1763_v21  ;;  %v1477_v20 = vsel %vm1233_vm3, 1.0, %v1763_v21 }
 0x429   : > { %1322 = vst [vmem:[#allocation9 + $0x28] sm:$0xff] %v1306_v17  ;;  %1321 = vst [vmem:[#allocation9 + $0x20] sm:$0xff] %v1305_v18  ;;  %v1282_v22 = vsub.f32 1.0, %v1478_v19  ;;  %v1281_v23 = vsub.f32 1.0, %v1477_v20 }
 0x42a   : > { %v1155_v24 = vpop.xlane.xlu1 %1154  ;;  %v1153_v25 = vpop.xlane.xlu0 %1152 }
 0x42b   : > { %v1298_v26 = vsel %vm1172_vm7, %v1282_v22, 0.0  ;;  %v1297_v27 = vsel %vm1172_vm7, %v1281_v23, 0.0 }
 0x42c   : > { %v1314_v28 = vsel %vm1123_vm6, %v1478_v19, %v1298_v26  ;;  %v1313_v29 = vsel %vm1123_vm6, %v1477_v20, %v1297_v27 }
 0x42d   : > { %1330 = vst [vmem:[#allocation9 + $0x68] sm:$0xff] %v1314_v28  ;;  %1329 = vst [vmem:[#allocation9 + $0x60] sm:$0xff] %v1313_v29 }
 0x42e   : > { %v1171_v30 = vpop.xlane.xlu1 %1170  ;;  %v1169_v31 = vpop.xlane.xlu0 %1168 }
 0x432   : > { %v1204_v32 = vpop.xlane.xlu1 %1203  ;;  %v1202_v33 = vpop.xlane.xlu0 %1201 }
 0x433   : > { %vm1228_vm4 = vcmp.ge.f32.partialorder %v1155_v24, %v1204_v32  ;;  %vm1227_vm5 = vcmp.ge.f32.partialorder %v1153_v25, %v1202_v33 }
 0x434   : > { %v1472_v34 = vsel %vm1228_vm4, 1.0, %v1763_v21  ;;  %v1471_v35 = vsel %vm1227_vm5, 1.0, %v1763_v21 }
 0x435   : > { %v1276_v36 = vsub.f32 1.0, %v1472_v34  ;;  %v1275_v37 = vsub.f32 1.0, %v1471_v35 }
 0x436   : > { %v1220_v38 = vpop.xlane.xlu1 %1219  ;;  %v1218_v39 = vpop.xlane.xlu0 %1217 }
 0x437   : > { %v1292_v40 = vsel %vm1172_vm7, %v1276_v36, 0.0  ;;  %v1291_v41 = vsel %vm1172_vm7, %v1275_v37, 0.0  ;;  %vm1236_vm8 = vcmp.ge.f32.partialorder %v1171_v30, %v1220_v38  ;;  %vm1235_vm9 = vcmp.ge.f32.partialorder %v1169_v31, %v1218_v39 }
 0x438   : > { %v1308_v42 = vsel %vm1123_vm6, %v1472_v34, %v1292_v40  ;;  %v1307_v43 = vsel %vm1123_vm6, %v1471_v35, %v1291_v41  ;;  %v1480_v44 = vsel %vm1236_vm8, 1.0, %v1763_v21  ;;  %v1479_v45 = vsel %vm1235_vm9, 1.0, %v1763_v21 }
 0x439   : > { %1324 = vst [vmem:[#allocation9 + $0x38] sm:$0xff] %v1308_v42  ;;  %1323 = vst [vmem:[#allocation9 + $0x30] sm:$0xff] %v1307_v43  ;;  %v1284_v47 = vsub.f32 1.0, %v1480_v44  ;;  %v1283_v48 = vsub.f32 1.0, %v1479_v45 }
 0x43b   : > { %v1300_v49 = vsel %vm1172_vm7, %v1284_v47, 0.0  ;;  %v1299_v50 = vsel %vm1172_vm7, %v1283_v48, 0.0 }
 0x43c   : > { %v1316_v51 = vsel %vm1123_vm6, %v1480_v44, %v1300_v49  ;;  %v1315_v52 = vsel %vm1123_vm6, %v1479_v45, %v1299_v50 }
 0x43d   : > { %1332 = vst [vmem:[#allocation9 + $0x78] sm:$0xff] %v1316_v51  ;;  %1331 = vst [vmem:[#allocation9 + $0x70] sm:$0xff] %v1315_v52 }
 0x43e PF: > { %p1636_p6 = scmp.eq.s32.totalorder %s1831_s16, 1  ;;  %s1764_s17 = smov [#allocation9]  }
 0x43f   : > { %s1339_s18 = sshll.u32 %s1764_s17, 4  ;;  %s1340_s18 = int_to_ptr.vmem [resolvable:$true] %s1339_s18 }
 0x440   : > { %s1711_s19 = scalar_lea.vmem %s1340_s18, 2048  ;;  %p1718_p0 = scmp.lt.s32.totalorder %s1340_s18, %s1340_s18 }
 0x441   : > { %p1712_p7 = scmp.ne.s32.totalorder %s1340_s18, %s1711_s19  ;;  %p1719_p1 = scmp.lt.s32.totalorder %s1711_s19, %s1711_s19 }
 0x443   : > { %p1713_p12 = pnand %p1712_p7, %p1636_p6  ;;  %p1720_p5 = por %p1719_p1, %p1718_p0 }
 0x445   : > { %p1714_p13 = pneg %p1713_p12 }
 0x447   : > { %p1721_p8 = pnand %p1720_p5, %p1714_p13 }
 0x449   : > { %1724 = shalt.err (!%p1721_p8)
}
 0x44a   : > { %s1765_s20 = smov 128   ;;  %s1766_s21 = smov 8  }
 0x44b   : > { %1622 = dma.vmem_to_hbm [thread:$0]  (%p1636_p6), %s1340_s18, 2048, %s2170_s10, [#allocation6], %s1765_s20, %s1765_s20, %s1766_s21  }
 0x44c   : > { %1748 = dma.done.wait (%p1636_p6), [#allocation6], 2048  }
 0x44d   : > { %1750 = vsyncadd (%p1636_p6), [#allocation6], 4294965248 }
 0x44e PF: > { %s24_s15 = sadd.s32 1, %s1753_s15  }
 0x44f   : > { %p21_p9 = scmp.ge.s32.totalorder %s24_s15, 4  }
 0x451   :  { %23 = sbr.rel (!%p21_p9) target bundleno = 5 (0x5), region = 107 }
 0x456   :  { %1355 = vsyncpa [#allocation5], 1 }
 0x457   :  { %1357 = vsyncpa [#allocation5 + $0x1], 1 }
 0x458   :  { %1358 = vsyncpa [#allocation8], 1 }
 0x459   :  { %1359 = vsyncpa [#allocation6], 1 }
 0x45a   :  { %1361 = vsyncpa [#allocation6 + $0x1], 1 }

</bundles_post_ra>
